<compile_context>
chip_gen: v7x
topology: tpu7x:2x2x1
jax: 0.10.0
libtpu: 0.0.40
codegen_flags: <defaults>
</compile_context>

<pallas_src>
import jax
import jax.numpy as jnp
from jax import lax
from jax.experimental import pallas as pl
from jax.experimental.pallas import tpu as pltpu


_LANE = 128          # lane-axis alignment for the hidden dim
_SUBLANE_BF16 = 16   # sublane packing granularity for bf16 row tiles


def _gelu_exact(x):
    # Matches torch.nn.GELU() default (erf-based, not tanh approximation).
    return 0.5 * x * (1.0 + lax.erf(x * (1.0 / jnp.sqrt(2.0).astype(x.dtype))))


def _round_up(x, m):
    return (x + m - 1) // m * m


def _cdiv(a, b):
    return (a + b - 1) // b


def _pad_to(a, shape, dtype):
    out = jnp.zeros(shape, dtype)
    return out.at[tuple(slice(0, s) for s in a.shape)].set(a.astype(dtype))


def _vmem_capacity_bytes():
    """Per-core VMEM capacity; conservative fallback if the query fails."""
    try:
        cap = getattr(pltpu.get_tpu_info(), "vmem_capacity_bytes", None)
        if cap:
            return int(cap)
    except Exception:
        pass
    return 64 * 1024 * 1024   # v7x per-core size — safe on every generation


def pack_params(params):
    """Pad + cast weights ONCE (hoisted out of the per-call path).

    Returns a dict of lane-aligned, MXU-ready arrays:
      w1 (Hp,Ip) bf16, w2 (Ip,Hp) bf16, w3 (Hp,Hp) bf16,
      b1 (1,Ip) f32, b2/b3 (1,Hp) f32, w4 (1,Hp) f32 row, b4 (1,1) f32.
    """
    H = params["w1"].shape[0]
    Hp = _round_up(H, _LANE)
    Ip = 2 * Hp
    return {
        "w1": _pad_to(params["w1"], (Hp, Ip), jnp.bfloat16),
        "b1": _pad_to(params["b1"], (1, Ip), jnp.float32),
        "w2": _pad_to(params["w2"], (Ip, Hp), jnp.bfloat16),
        "b2": _pad_to(params["b2"], (1, Hp), jnp.float32),
        "w3": _pad_to(params["w3"], (Hp, Hp), jnp.bfloat16),
        "b3": _pad_to(params["b3"], (1, Hp), jnp.float32),
        "w4": _pad_to(jnp.transpose(params["w4"]), (1, Hp), jnp.float32),
        "b4": params["b4"].reshape(1, 1).astype(jnp.float32),
    }


def _computation_unit_kernel(
    x_ref,      # (TM, Hp)  bf16  activation tile (streamed)
    w1_ref,     # (Hp, Ip)  bf16  resident, single-buffered
    b1_ref,     # (1, Ip)   f32   resident
    w2_ref,     # (Ip, Hp)  bf16  resident
    b2_ref,     # (1, Hp)   f32   resident
    w3_ref,     # (Hp, Hp)  bf16  resident
    b3_ref,     # (1, Hp)   f32   resident
    w4_ref,     # (1, Hp)   f32   resident row (VPU/XLU reduce)
    b4_ref,     # (1, 1)    f32   SMEM scalar
    res_ref,    # (TM, Hp)  out: results tile
    conf_ref,   # (TM, 1)   out: confidence column (exact bytes, no broadcast)
):
    x = x_ref[...]  # bf16 straight into the MXU

    # compute_layers: Linear -> GELU -> Linear  (bf16 MXU, f32 accumulate)
    h1 = jnp.dot(x, w1_ref[...], preferred_element_type=jnp.float32) + b1_ref[...]
    h1 = _gelu_exact(h1)
    results = (
        jnp.dot(h1.astype(jnp.bfloat16), w2_ref[...],
                preferred_element_type=jnp.float32)
        + b2_ref[...]
    )
    res_ref[...] = results.astype(res_ref.dtype)

    # confidence_estimator(results): Linear -> GELU -> (VPU reduce) -> Sigmoid
    c1 = (
        jnp.dot(results.astype(jnp.bfloat16), w3_ref[...],
                preferred_element_type=jnp.float32)
        + b3_ref[...]
    )
    c1 = _gelu_exact(c1)
    # N=1 linear as per-lane multiply + cross-lane reduce (no MXU pass).
    c2 = jnp.sum(c1 * w4_ref[...], axis=-1, keepdims=True) + b4_ref[0, 0]
    conf_ref[...] = jax.nn.sigmoid(c2).astype(conf_ref.dtype)   # (TM, 1)


def computation_unit_forward(hidden_states, packed, *, tm=512):
    """hidden_states: [B, S, H]; packed = pack_params(params).

    Returns (results [B,S,H], confidence [B,S,1]).
    """
    B, S, H = hidden_states.shape
    M = B * S
    out_dtype = hidden_states.dtype
    out_bytes = jnp.dtype(out_dtype).itemsize

    Hp, Ip = packed["w1"].shape          # padded hidden / intermediate dims
    assert Hp >= H and Hp % _LANE == 0

    # --- row-tile selection --------------------------------------------------
    # Multiple of 16 (bf16 sublane packing); balanced tile count to minimize
    # last-tile zero padding; >= 2 grid steps when M allows (v7x megacore).
    tm = max(_SUBLANE_BF16, int(tm))
    n_tiles = max(1, _cdiv(M, tm))
    if n_tiles < 2 and M > _SUBLANE_BF16:
        n_tiles = 2
    TM = _round_up(_cdiv(M, n_tiles), _SUBLANE_BF16)
    n_tiles = _cdiv(M, TM)
    Mp = n_tiles * TM

    # --- activations: only pad/copy when actually misaligned ------------------
    x2 = hidden_states.reshape(M, H)
    if H == Hp and M == Mp:
        x_p = x2.astype(jnp.bfloat16)
    else:
        x_p = _pad_to(x2, (Mp, Hp), jnp.bfloat16)

    # --- VMEM budget (resident weights single-buffered, I/O double-buffered) --
    bytes_weights = 2 * (2 * Hp * Ip + Hp * Hp) + 4 * (Ip + 3 * Hp)
    bytes_x = 2 * (TM * Hp * 2)
    bytes_out = 2 * (TM * Hp * out_bytes + TM * out_bytes)
    bytes_tmp = 4 * TM * (2 * Ip + 3 * Hp)           # f32/bf16 temporaries, with margin
    vmem_needed = bytes_weights + bytes_x + bytes_out + bytes_tmp
    vmem_cap = max(_vmem_capacity_bytes() - 16 * 1024 * 1024, 16 * 1024 * 1024)
    vmem_limit = min(max(int(1.25 * vmem_needed), 16 * 1024 * 1024), vmem_cap)
    # TODO(synk): when bytes_weights approaches vmem_cap (e.g. H >= ~2048 on
    # v7x), switch to a K-tiled / pltpu.emit_pipeline weight-streaming path
    # instead of the resident-weight strategy.

    def _resident(shape):
        # Constant block index -> fetched once; single buffer halves VMEM.
        return pl.BlockSpec(shape, lambda i: (0, 0), pipeline_mode=pl.Buffered(1))

    in_specs = [
        pl.BlockSpec((TM, Hp), lambda i: (i, 0)),            # x tile (streamed)
        _resident((Hp, Ip)),                                 # w1
        _resident((1, Ip)),                                  # b1
        _resident((Ip, Hp)),                                 # w2
        _resident((1, Hp)),                                  # b2
        _resident((Hp, Hp)),                                 # w3
        _resident((1, Hp)),                                  # b3
        _resident((1, Hp)),                                  # w4 row
        pl.BlockSpec(memory_space=pltpu.MemorySpace.SMEM),   # b4 scalar
    ]
    out_specs = (
        pl.BlockSpec((TM, Hp), lambda i: (i, 0)),            # results tile
        pl.BlockSpec((TM, 1), lambda i: (i, 0)),             # confidence column
    )

    cost = pl.CostEstimate(
        flops=2 * Mp * (Hp * Ip + Ip * Hp + Hp * Hp + Hp),
        transcendentals=Mp * (Ip + Hp + 1),
        bytes_accessed=(
            Mp * Hp * 2                                      # x (bf16)
            + Mp * Hp * out_bytes + Mp * out_bytes           # results + confidence
            + 2 * (2 * Hp * Ip + Hp * Hp)                    # bf16 weights (single copy)
            + 4 * (Ip + 3 * Hp + 1)                          # f32 biases / w4 / b4
        ),
    )

    results_p, conf_p = pl.pallas_call(
        _computation_unit_kernel,
        grid=(n_tiles,),
        in_specs=in_specs,
        out_specs=out_specs,
        out_shape=(
            jax.ShapeDtypeStruct((Mp, Hp), out_dtype),
            jax.ShapeDtypeStruct((Mp, 1), out_dtype),
        ),
        compiler_params=pltpu.CompilerParams(
            dimension_semantics=("parallel",),
            vmem_limit_bytes=int(vmem_limit),
        ),
        cost_estimate=cost,
    )(x_p, packed["w1"], packed["b1"], packed["w2"], packed["b2"],
      packed["w3"], packed["b3"], packed["w4"], packed["b4"])

    results = results_p[:M, :H].reshape(B, S, H)
    confidence = conf_p[:M].reshape(B, S, 1)
    return results, confidence


def init_params(key, hidden_size):
    """Deterministic synthetic parameter init (shapes match the nn.Module)."""
    ks = jax.random.split(key, 8)
    scale = 0.02
    H = hidden_size
    return {
        # compute_layers
        "w1": scale * jax.random.normal(ks[0], (H, 2 * H), jnp.float32),
        "b1": scale * jax.random.normal(ks[1], (1, 2 * H), jnp.float32),
        "w2": scale * jax.random.normal(ks[2], (2 * H, H), jnp.float32),
        "b2": scale * jax.random.normal(ks[3], (1, H), jnp.float32),
        # confidence_estimator
        "w3": scale * jax.random.normal(ks[4], (H, H), jnp.float32),
        "b3": scale * jax.random.normal(ks[5], (1, H), jnp.float32),
        "w4": scale * jax.random.normal(ks[6], (H, 1), jnp.float32),
        "b4": scale * jax.random.normal(ks[7], (1, 1), jnp.float32),
    }


def _reference(hidden_states, params):
    """Pure-JAX f32 reference for a sanity check."""
    x = hidden_states.astype(jnp.float32)
    h1 = _gelu_exact(x @ params["w1"] + params["b1"])
    results = h1 @ params["w2"] + params["b2"]
    c1 = _gelu_exact(results @ params["w3"] + params["b3"])
    confidence = jax.nn.sigmoid(c1 @ params["w4"] + params["b4"])
    return results, confidence


if __name__ == "__main__":
    batch, seq, hidden = 2, 8, 32
    key = jax.random.PRNGKey(0)
    k_x, k_p = jax.random.split(key)

    hidden_states = jax.random.normal(k_x, (batch, seq, hidden), jnp.float32)
    params = init_params(k_p, hidden)

    # Weight packing happens once (would be cached alongside the params).
    packed = pack_params(params)
    jax.block_until_ready(packed)

    results, confidence = computation_unit_forward(hidden_states, packed)
    jax.block_until_ready((results, confidence))

    # Correctness check against the pure-f32 reference (bf16 MXU operands ->
    # slightly looser tolerances than a pure-f32 kernel).
    ref_res, ref_conf = _reference(hidden_states, params)
    assert results.shape == (batch, seq, hidden)
    assert confidence.shape == (batch, seq, 1)
    assert jnp.allclose(results, ref_res, atol=1e-2, rtol=2e-2)
    assert jnp.allclose(confidence, ref_conf, atol=1e-2, rtol=2e-2)

    print("KERNEL_OK")
</pallas_src>

<mosaic_0001>
module attributes {stable_mosaic.version = 11 : i64} {
  func.func @_computation_unit_kernel(%arg0: i32, %arg1: memref<16x128xbf16, #tpu.memory_space<vmem>>, %arg2: memref<128x256xbf16, #tpu.memory_space<vmem>>, %arg3: memref<1x256xf32, #tpu.memory_space<vmem>>, %arg4: memref<256x128xbf16, #tpu.memory_space<vmem>>, %arg5: memref<1x128xf32, #tpu.memory_space<vmem>>, %arg6: memref<128x128xbf16, #tpu.memory_space<vmem>>, %arg7: memref<1x128xf32, #tpu.memory_space<vmem>>, %arg8: memref<1x128xf32, #tpu.memory_space<vmem>>, %arg9: memref<1x1xf32, #tpu.memory_space<smem>>, %arg10: memref<16x128xf32, #tpu.memory_space<vmem>>, %arg11: memref<16x1xf32, #tpu.memory_space<vmem>>) attributes {dimension_semantics = [#tpu.dimension_semantics<parallel>], iteration_bounds = array<i64: 1>, scalar_prefetch = 0 : i64, scratch_operands = 0 : i64, tpu.core_type = #tpu.core_type<tc>, window_params = [{transform_indices = @transform_0, window_bounds = array<i64: 16, 128>}, {pipeline_mode = #tpu.pipeline_mode<synchronous>, transform_indices = @transform_1, window_bounds = array<i64: 128, 256>}, {pipeline_mode = #tpu.pipeline_mode<synchronous>, transform_indices = @transform_2, window_bounds = array<i64: 1, 256>}, {pipeline_mode = #tpu.pipeline_mode<synchronous>, transform_indices = @transform_3, window_bounds = array<i64: 256, 128>}, {pipeline_mode = #tpu.pipeline_mode<synchronous>, transform_indices = @transform_4, window_bounds = array<i64: 1, 128>}, {pipeline_mode = #tpu.pipeline_mode<synchronous>, transform_indices = @transform_5, window_bounds = array<i64: 128, 128>}, {pipeline_mode = #tpu.pipeline_mode<synchronous>, transform_indices = @transform_6, window_bounds = array<i64: 1, 128>}, {pipeline_mode = #tpu.pipeline_mode<synchronous>, transform_indices = @transform_7, window_bounds = array<i64: 1, 128>}, {transform_indices = @transform_8, window_bounds = array<i64: 1, 1>}, {transform_indices = @transform_9, window_bounds = array<i64: 16, 128>}, {transform_indices = @transform_10, window_bounds = array<i64: 16, 1>}]} {
    %c0 = arith.constant 0 : index
    %c0_0 = arith.constant 0 : index
    %0 = vector.load %arg1[%c0, %c0_0] : memref<16x128xbf16, #tpu.memory_space<vmem>>, vector<16x128xbf16>
    %c0_1 = arith.constant 0 : index
    %c0_2 = arith.constant 0 : index
    %1 = vector.load %arg2[%c0_1, %c0_2] : memref<128x256xbf16, #tpu.memory_space<vmem>>, vector<128x256xbf16>
    %cst = arith.constant dense<0.000000e+00> : vector<16x256xf32>
    %2 = tpu.matmul %0, %1, %cst {dimension_numbers = #tpu.dot_dimension_numbers<[1], [0], [0], [1], [0, 0, 1, 1], [], []>} : vector<16x128xbf16>, vector<128x256xbf16>, vector<16x256xf32> -> vector<16x256xf32>
    %c0_3 = arith.constant 0 : index
    %c0_4 = arith.constant 0 : index
    %3 = vector.load %arg3[%c0_3, %c0_4] : memref<1x256xf32, #tpu.memory_space<vmem>>, vector<1x256xf32>
    %4 = vector.broadcast %3 : vector<1x256xf32> to vector<16x256xf32>
    %5 = arith.addf %2, %4 : vector<16x256xf32>
    %cst_5 = arith.constant 5.000000e-01 : f32
    %6 = vector.broadcast %cst_5 : f32 to vector<16x256xf32>
    %7 = arith.mulf %6, %5 : vector<16x256xf32>
    %cst_6 = arith.constant 2.000000e+00 : f32
    %8 = math.sqrt %cst_6 : f32
    %cst_7 = arith.constant 1.000000e+00 : f32
    %9 = arith.divf %cst_7, %8 : f32
    %10 = vector.broadcast %9 : f32 to vector<16x256xf32>
    %11 = arith.mulf %5, %10 : vector<16x256xf32>
    %12 = math.erf %11 : vector<16x256xf32>
    %cst_8 = arith.constant 1.000000e+00 : f32
    %13 = vector.broadcast %cst_8 : f32 to vector<16x256xf32>
    %14 = arith.addf %13, %12 : vector<16x256xf32>
    %15 = arith.mulf %7, %14 : vector<16x256xf32>
    %16 = arith.truncf %15 : vector<16x256xf32> to vector<16x256xbf16>
    %c0_9 = arith.constant 0 : index
    %c0_10 = arith.constant 0 : index
    %17 = vector.load %arg4[%c0_9, %c0_10] : memref<256x128xbf16, #tpu.memory_space<vmem>>, vector<256x128xbf16>
    %cst_11 = arith.constant dense<0.000000e+00> : vector<16x128xf32>
    %18 = tpu.matmul %16, %17, %cst_11 {dimension_numbers = #tpu.dot_dimension_numbers<[1], [0], [0], [1], [0, 0, 1, 1], [], []>} : vector<16x256xbf16>, vector<256x128xbf16>, vector<16x128xf32> -> vector<16x128xf32>
    %c0_12 = arith.constant 0 : index
    %c0_13 = arith.constant 0 : index
    %19 = vector.load %arg5[%c0_12, %c0_13] : memref<1x128xf32, #tpu.memory_space<vmem>>, vector<1x128xf32>
    %20 = vector.broadcast %19 : vector<1x128xf32> to vector<16x128xf32>
    %21 = arith.addf %18, %20 : vector<16x128xf32>
    %c0_14 = arith.constant 0 : index
    %c0_15 = arith.constant 0 : index
    %22 = vector.load %arg10[%c0_14, %c0_15] : memref<16x128xf32, #tpu.memory_space<vmem>>, vector<16x128xf32>
    tpu.vector_store %arg10[%c0_14, %c0_15], %21 {strides = array<i32>} : memref<16x128xf32, #tpu.memory_space<vmem>>, vector<16x128xf32>,
    %23 = arith.truncf %21 : vector<16x128xf32> to vector<16x128xbf16>
    %c0_16 = arith.constant 0 : index
    %c0_17 = arith.constant 0 : index
    %24 = vector.load %arg6[%c0_16, %c0_17] : memref<128x128xbf16, #tpu.memory_space<vmem>>, vector<128x128xbf16>
    %cst_18 = arith.constant dense<0.000000e+00> : vector<16x128xf32>
    %25 = tpu.matmul %23, %24, %cst_18 {dimension_numbers = #tpu.dot_dimension_numbers<[1], [0], [0], [1], [0, 0, 1, 1], [], []>} : vector<16x128xbf16>, vector<128x128xbf16>, vector<16x128xf32> -> vector<16x128xf32>
    %c0_19 = arith.constant 0 : index
    %c0_20 = arith.constant 0 : index
    %26 = vector.load %arg7[%c0_19, %c0_20] : memref<1x128xf32, #tpu.memory_space<vmem>>, vector<1x128xf32>
    %27 = vector.broadcast %26 : vector<1x128xf32> to vector<16x128xf32>
    %28 = arith.addf %25, %27 : vector<16x128xf32>
    %cst_21 = arith.constant 5.000000e-01 : f32
    %29 = vector.broadcast %cst_21 : f32 to vector<16x128xf32>
    %30 = arith.mulf %29, %28 : vector<16x128xf32>
    %cst_22 = arith.constant 2.000000e+00 : f32
    %31 = math.sqrt %cst_22 : f32
    %cst_23 = arith.constant 1.000000e+00 : f32
    %32 = arith.divf %cst_23, %31 : f32
    %33 = vector.broadcast %32 : f32 to vector<16x128xf32>
    %34 = arith.mulf %28, %33 : vector<16x128xf32>
    %35 = math.erf %34 : vector<16x128xf32>
    %cst_24 = arith.constant 1.000000e+00 : f32
    %36 = vector.broadcast %cst_24 : f32 to vector<16x128xf32>
    %37 = arith.addf %36, %35 : vector<16x128xf32>
    %38 = arith.mulf %30, %37 : vector<16x128xf32>
    %c0_25 = arith.constant 0 : index
    %c0_26 = arith.constant 0 : index
    %39 = vector.load %arg8[%c0_25, %c0_26] : memref<1x128xf32, #tpu.memory_space<vmem>>, vector<1x128xf32>
    %40 = vector.broadcast %39 : vector<1x128xf32> to vector<16x128xf32>
    %41 = arith.mulf %38, %40 : vector<16x128xf32>
    %cst_27 = arith.constant dense<0.000000e+00> : vector<16xf32>
    %42 = vector.multi_reduction <add>, %41, %cst_27 [1] : vector<16x128xf32> to vector<16xf32>
    %43 = vector.shape_cast %42 : vector<16xf32> to vector<16x1xf32>
    %c0_28 = arith.constant 0 : index
    %c0_29 = arith.constant 0 : index
    %44 = memref.load %arg9[%c0_28, %c0_29] : memref<1x1xf32, #tpu.memory_space<smem>>
    %45 = vector.broadcast %44 : f32 to vector<16x1xf32>
    %46 = arith.addf %43, %45 : vector<16x1xf32>
    %47 = arith.negf %46 : vector<16x1xf32>
    %48 = math.exp %47 : vector<16x1xf32>
    %cst_30 = arith.constant 1.000000e+00 : f32
    %49 = vector.broadcast %cst_30 : f32 to vector<16x1xf32>
    %50 = arith.addf %49, %48 : vector<16x1xf32>
    %51 = arith.divf %49, %50 : vector<16x1xf32>
    %c0_31 = arith.constant 0 : index
    %c0_32 = arith.constant 0 : index
    %52 = vector.load %arg11[%c0_31, %c0_32] : memref<16x1xf32, #tpu.memory_space<vmem>>, vector<16x1xf32>
    tpu.vector_store %arg11[%c0_31, %c0_32], %51 {strides = array<i32>} : memref<16x1xf32, #tpu.memory_space<vmem>>, vector<16x1xf32>,
    return
  }
  func.func @transform_0(%arg0: i32) -> (i32, i32) {
    %c0_i32 = arith.constant 0 : i32
    %c0_i32_0 = arith.constant 0 : i32
    return %arg0, %c0_i32 : i32, i32
  }
  func.func @transform_1(%arg0: i32) -> (i32, i32) {
    %c0_i32 = arith.constant 0 : i32
    %c0_i32_0 = arith.constant 0 : i32
    %c0_i32_1 = arith.constant 0 : i32
    return %c0_i32, %c0_i32_0 : i32, i32
  }
  func.func @transform_2(%arg0: i32) -> (i32, i32) {
    %c0_i32 = arith.constant 0 : i32
    %c0_i32_0 = arith.constant 0 : i32
    %c0_i32_1 = arith.constant 0 : i32
    return %c0_i32, %c0_i32_0 : i32, i32
  }
  func.func @transform_3(%arg0: i32) -> (i32, i32) {
    %c0_i32 = arith.constant 0 : i32
    %c0_i32_0 = arith.constant 0 : i32
    %c0_i32_1 = arith.constant 0 : i32
    return %c0_i32, %c0_i32_0 : i32, i32
  }
  func.func @transform_4(%arg0: i32) -> (i32, i32) {
    %c0_i32 = arith.constant 0 : i32
    %c0_i32_0 = arith.constant 0 : i32
    %c0_i32_1 = arith.constant 0 : i32
    return %c0_i32, %c0_i32_0 : i32, i32
  }
  func.func @transform_5(%arg0: i32) -> (i32, i32) {
    %c0_i32 = arith.constant 0 : i32
    %c0_i32_0 = arith.constant 0 : i32
    %c0_i32_1 = arith.constant 0 : i32
    return %c0_i32, %c0_i32_0 : i32, i32
  }
  func.func @transform_6(%arg0: i32) -> (i32, i32) {
    %c0_i32 = arith.constant 0 : i32
    %c0_i32_0 = arith.constant 0 : i32
    %c0_i32_1 = arith.constant 0 : i32
    return %c0_i32, %c0_i32_0 : i32, i32
  }
  func.func @transform_7(%arg0: i32) -> (i32, i32) {
    %c0_i32 = arith.constant 0 : i32
    %c0_i32_0 = arith.constant 0 : i32
    %c0_i32_1 = arith.constant 0 : i32
    return %c0_i32, %c0_i32_0 : i32, i32
  }
  func.func @transform_8(%arg0: i32) -> (i32, i32) {
    %c0_i32 = arith.constant 0 : i32
    %c0_i32_0 = arith.constant 0 : i32
    %c0_i32_1 = arith.constant 0 : i32
    return %c0_i32, %c0_i32_0 : i32, i32
  }
  func.func @transform_9(%arg0: i32) -> (i32, i32) {
    %c0_i32 = arith.constant 0 : i32
    %c0_i32_0 = arith.constant 0 : i32
    return %arg0, %c0_i32 : i32, i32
  }
  func.func @transform_10(%arg0: i32) -> (i32, i32) {
    %c0_i32 = arith.constant 0 : i32
    %c0_i32_0 = arith.constant 0 : i32
    return %arg0, %c0_i32 : i32, i32
  }
}

</mosaic_0001>

<bundles_post_ra>
// kernel: tpu_custom_call.1
= control target key start
LH: loop header
LB: loop body
LE: loop exit
PB: predicated region body
PF: predicated region fallthrough
CT: control target
= control target key end

     0   :  { %17 = vsyncpa [#allocation4], 0  ;;  %s1104_s0 = inlined_call_operand.hbm [shape: bf16[16,128], index: 0, kind: input, shape index: {}]   ;;  %s1105_s1 = inlined_call_operand.hbm [shape: bf16[128,256], index: 1, kind: input, shape index: {}]   ;;  %s1106_s2 = inlined_call_operand.vmem [shape: f32[1,256], index: 2, kind: input, shape index: {}]   ;;  %s1107_s3 = inlined_call_operand.hbm [shape: bf16[256,128], index: 3, kind: input, shape index: {}]   ;;  %s1108_s4 = inlined_call_operand.vmem [shape: f32[1,128], index: 4, kind: input, shape index: {}]   ;;  %s1109_s5 = inlined_call_operand.hbm [shape: bf16[128,128], index: 5, kind: input, shape index: {}]   ;;  %s1110_s6 = inlined_call_operand.vmem [shape: f32[1,128], index: 6, kind: input, shape index: {}]   ;;  %s1111_s7 = inlined_call_operand.vmem [shape: f32[1,128], index: 7, kind: input, shape index: {}]   ;;  %s1112_s8 = inlined_call_operand.<no memory space> [shape: f32[1,1], index: 8, kind: input, shape index: {}]   ;;  %s1113_s9 = inlined_call_operand.hbm [shape: f32[16,128], index: 9, kind: output, shape index: {0}]   ;;  %s1114_s10 = inlined_call_operand.vmem [shape: f32[16,1], index: 10, kind: output, shape index: {1}]  }
   0x1   :  { %18 = vsyncpa [#allocation7], 0 }
   0x2   :  { %19 = vsyncpa [#allocation10], 0 }
   0x3   :  { %20 = vsyncpa [#allocation5], 0  ;;  %s925_s13 = smov [#allocation6]   ;;  %s807_s17 = scalar_lea.hbm %s1105_s1, 2048 }
   0x4   :  { %s38_s14 = sshll.u32 %s925_s13, 4  ;;  %p808_p0 = scmp.ne.s32.totalorder %s1105_s1, %s807_s17  ;;  %s39_s14 = int_to_ptr.vmem [resolvable:$true] %s38_s14 }
   0x5   :  { %p811_p1 = scmp.lt.u32.totalorder %s807_s17, %s1105_s1 }
   0x7   :  { %p813_p2 = pnand %p811_p1, %p808_p0 }
   0x9   :  { %816 = shalt.err (!%p813_p2)
}
   0xa   :  { %s817_s22 = scalar_lea.vmem %s39_s14, 2048  ;;  %p822_p4 = scmp.lt.s32.totalorder %s39_s14, %s39_s14 }
   0xb   :  { %p818_p3 = scmp.ne.s32.totalorder %s39_s14, %s817_s22  ;;  %p823_p5 = scmp.lt.s32.totalorder %s817_s22, %s817_s22 }
   0xd   :  { %p824_p6 = por %p823_p5, %p822_p4 }
   0xf   :  { %p825_p7 = pnand %p824_p6, %p818_p3 }
  0x11   :  { %828 = shalt.err (!%p825_p7)
}
  0x12   :  { %s926_s23 = smov 128   ;;  %s927_s24 = smov 8  }
  0x13   :  { %44 = dma.hbm_to_vmem [thread:$0]  %s1105_s1, 2048, %s39_s14, [#allocation7], %s926_s23, %s926_s23, %s927_s24  }
  0x14   :  { %s928_s27 = smov [#allocation3]   ;;  %s829_s11 = scalar_lea.hbm %s1104_s0, 128 }
  0x15   :  { %s26_s28 = sshll.u32 %s928_s27, 4  ;;  %p830_p8 = scmp.ne.s32.totalorder %s1104_s0, %s829_s11  ;;  %s27_s28 = int_to_ptr.vmem [resolvable:$true] %s26_s28 }
  0x16   :  { %p833_p9 = scmp.lt.u32.totalorder %s829_s11, %s1104_s0 }
  0x18   :  { %p835_p10 = pnand %p833_p9, %p830_p8 }
  0x1a   :  { %838 = shalt.err (!%p835_p10)
}
  0x1b   :  { %s839_s17 = scalar_lea.vmem %s27_s28, 128  ;;  %p844_p12 = scmp.lt.s32.totalorder %s27_s28, %s27_s28 }
  0x1c   :  { %p840_p11 = scmp.ne.s32.totalorder %s27_s28, %s839_s17  ;;  %p845_p13 = scmp.lt.s32.totalorder %s839_s17, %s839_s17 }
  0x1e   :  { %p846_p0 = por %p845_p13, %p844_p12 }
  0x20   :  { %p847_p1 = pnand %p846_p0, %p840_p11 }
  0x22   :  { %850 = shalt.err (!%p847_p1)
}
  0x23   :  { %s929_s1 = smov 64   ;;  %s930_s14 = smov 4  }
  0x24   :  { %32 = dma.hbm_to_vmem [thread:$0]  %s1104_s0, 128, %s27_s28, [#allocation4], %s929_s1, %s929_s1, %s930_s14  }
  0x25   :  { %s931_s20 = smov [#allocation8]   ;;  %s932_s22 = smov [#allocation9]  }
  0x26   :  { %s52_s21 = sshll.u32 %s931_s20, 4  ;;  %s66_s25 = sshll.u32 %s932_s22, 4  ;;  %s53_s21 = int_to_ptr.vmem [resolvable:$true] %s52_s21  ;;  %s1022_s25 = int_to_ptr.vmem [resolvable:$true] %s66_s25 }
  0x27   :  { %s851_s29 = scalar_lea.hbm %s1107_s3, 2048 }
  0x28   :  { %p852_p2 = scmp.ne.s32.totalorder %s1107_s3, %s851_s29  ;;  %p855_p3 = scmp.lt.u32.totalorder %s851_s29, %s1107_s3 }
  0x2a   :  { %p857_p4 = pnand %p855_p3, %p852_p2 }
  0x2c   :  { %860 = shalt.err (!%p857_p4)
}
  0x2d   :  { %s861_s0 = scalar_lea.vmem %s53_s21, 2048  ;;  %p866_p6 = scmp.lt.s32.totalorder %s53_s21, %s53_s21 }
  0x2e   :  { %p862_p5 = scmp.ne.s32.totalorder %s53_s21, %s861_s0  ;;  %p867_p7 = scmp.lt.s32.totalorder %s861_s0, %s861_s0 }
  0x30   :  { %p868_p8 = por %p867_p7, %p866_p6 }
  0x32   :  { %p869_p9 = pnand %p868_p8, %p862_p5 }
  0x34   :  { %872 = shalt.err (!%p869_p9)
}
  0x35   :  { %58 = dma.hbm_to_vmem [thread:$0]  %s1107_s3, 2048, %s53_s21, [#allocation7], %s929_s1, %s929_s1, %s930_s14  }
  0x36   :  { %s873_s18 = scalar_lea.hbm %s1109_s5, 1024 }
  0x37   :  { %p874_p10 = scmp.ne.s32.totalorder %s1109_s5, %s873_s18  ;;  %p877_p11 = scmp.lt.u32.totalorder %s873_s18, %s1109_s5 }
  0x39   :  { %p879_p12 = pnand %p877_p11, %p874_p10 }
  0x3b   :  { %882 = shalt.err (!%p879_p12)
}
  0x3c   :  { %s883_s27 = scalar_lea.vmem %s1022_s25, 1024  ;;  %p888_p0 = scmp.lt.s32.totalorder %s1022_s25, %s1022_s25 }
  0x3d   :  { %p884_p13 = scmp.ne.s32.totalorder %s1022_s25, %s883_s27  ;;  %p889_p1 = scmp.lt.s32.totalorder %s883_s27, %s883_s27 }
  0x3f   :  { %p890_p2 = por %p889_p1, %p888_p0 }
  0x41   :  { %p891_p3 = pnand %p890_p2, %p884_p13 }
  0x43   :  { %894 = shalt.err (!%p891_p3)
}
  0x44   :  { %72 = dma.hbm_to_vmem [thread:$0]  %s1109_s5, 1024, %s1022_s25, [#allocation10], %s929_s1, %s929_s1, %s930_s14  }
  0x45   :  { %917 = dma.done.wait [#allocation4], 128  }
  0x46   :  { %918 = vsyncadd [#allocation4], 4294967168 }
  0x47   :  { %919 = dma.done.wait [#allocation7], 4096  }
  0x48   :  { %920 = vsyncadd [#allocation7], 4294963200 }
  0x49   :  { %921 = dma.done.wait [#allocation10], 1024  }
  0x4a   :  { %922 = vsyncadd [#allocation10], 4294966272  ;;  %v933_v0 = vmov 0   ;;  %v738_v1 = vld [vmem:[#allocation6 + $0x4] ss:$8 sps:$4 sm:$0xff]   ;;  %v762_v21 = vld [vmem:[#allocation3] sm:$0xff]   ;;  %v112_v41 = vlaneseq }
  0x4b   :  { %240 = vmatprep.mubr.bf16.mxu0 %v933_v0  ;;  %v740_v2 = vld [vmem:[#allocation6] ss:$8 sps:$4 sm:$0xff]   ;;  %208 = vmatprep.subr.bf16.mxu0 %v738_v1  ;;  %v741_v3 = vld [vmem:[#allocation6 + $0x14] ss:$8 sps:$4 sm:$0xff]   ;;  %v743_v4 = vld [vmem:[#allocation6 + $0x10] ss:$8 sps:$4 sm:$0xff]  }
  0x4c   :  { %209 = vmatpush1.bf16.msra.mxu0 %v740_v2  ;;  %v744_v5 = vld [vmem:[#allocation6 + $0x24] ss:$8 sps:$4 sm:$0xff]   ;;  %v746_v6 = vld [vmem:[#allocation6 + $0x20] ss:$8 sps:$4 sm:$0xff]   ;;  %v747_v7 = vld [vmem:[#allocation6 + $0x34] ss:$8 sps:$4 sm:$0xff]  }
  0x4d   :  { %210 = vmatprep.subr.bf16.mxu0 %v741_v3  ;;  %v749_v8 = vld [vmem:[#allocation6 + $0x30] ss:$8 sps:$4 sm:$0xff]   ;;  %v750_v9 = vld [vmem:[#allocation6 + $0x44] ss:$8 sps:$4 sm:$0xff]   ;;  %v752_v11 = vld [vmem:[#allocation6 + $0x40] ss:$8 sps:$4 sm:$0xff]  }
  0x4e   :  { %v763_v10 = vld [vmem:[#allocation8 + $0x40] sm:$0xff]   ;;  %v765_v13 = vld [vmem:[#allocation8 + $0x48] sm:$0xff]   ;;  %v753_v14 = vld [vmem:[#allocation6 + $0x54] ss:$8 sps:$4 sm:$0xff]   ;;  %v934_v35 = vmov 0.0   ;;  %v113_v42 = vshrl.u32 %v112_v41, 7 }
  0x4f   :  { %v764_v12 = vld [vmem:[#allocation8] sm:$0xff]   ;;  %675 = vmatprep.subr.bf16.mxu1 %v763_v10  ;;  %v766_v15 = vld [vmem:[#allocation8 + $0x8] sm:$0xff]   ;;  %v755_v16 = vld [vmem:[#allocation6 + $0x50] ss:$8 sps:$4 sm:$0xff]   ;;  %vm935_vm0 = vmmov 0  }
  0x50   :  { %211 = vmatpush1.bf16.msra.mxu0 %v743_v4  ;;  %676 = vmatpush3.bf16.msra.mxu1 %v764_v12  ;;  %v756_v17 = vld [vmem:[#allocation6 + $0x64] ss:$8 sps:$4 sm:$0xff]   ;;  %v758_v18 = vld [vmem:[#allocation6 + $0x60] ss:$8 sps:$4 sm:$0xff]   ;;  %v759_v19 = vld [vmem:[#allocation6 + $0x74] ss:$8 sps:$4 sm:$0xff]  }
  0x51   :  { %212 = vmatprep.subr.bf16.mxu0 %v744_v5  ;;  %677 = vmatprep.subr.bf16.mxu1 %v765_v13  ;;  %v761_v20 = vld [vmem:[#allocation6 + $0x70] ss:$8 sps:$4 sm:$0xff]   ;;  %v771_v26 = vld [vmem:[#allocation8 + $0x60] sm:$0xff]   ;;  %v773_v28 = vld [vmem:[#allocation8 + $0x68] sm:$0xff]   ;;  %v114_v43 = vsub.s32 0, %v113_v42  ;;  %v118_v45 = vsub.s32 1, %v113_v42 }
  0x52   :  { %v767_v22 = vld [vmem:[#allocation8 + $0x50] sm:$0xff]   ;;  %v769_v24 = vld [vmem:[#allocation8 + $0x58] sm:$0xff]   ;;  %v772_v27 = vld [vmem:[#allocation8 + $0x20] sm:$0xff]  }
  0x53   :  { %v768_v23 = vld [vmem:[#allocation8 + $0x10] sm:$0xff]   ;;  %v770_v25 = vld [vmem:[#allocation8 + $0x18] sm:$0xff]   ;;  %v774_v29 = vld [vmem:[#allocation8 + $0x28] sm:$0xff]  }
  0x54   :  { %213 = vmatpush1.bf16.msra.mxu0 %v746_v6  ;;  %678 = vmatpush3.bf16.msra.mxu1 %v766_v15  ;;  %v775_v30 = vld [vmem:[#allocation8 + $0x70] sm:$0xff]   ;;  %v777_v32 = vld [vmem:[#allocation8 + $0x78] sm:$0xff]   ;;  %v779_v34 = vld [vmem:[#allocation9] sm:$0xff]  }
  0x55   :  { %214 = vmatprep.subr.bf16.mxu0 %v747_v7  ;;  %679 = vmatprep.subr.bf16.mxu1 %v767_v22  ;;  %v776_v31 = vld [vmem:[#allocation8 + $0x30] sm:$0xff]   ;;  %v778_v33 = vld [vmem:[#allocation8 + $0x38] sm:$0xff]   ;;  %v780_v36 = vld [vmem:[#allocation9 + $0x8] sm:$0xff]  }
  0x56   :  { %v781_v37 = vld [vmem:[#allocation9 + $0x10] sm:$0xff]   ;;  %v782_v38 = vld [vmem:[#allocation9 + $0x18] sm:$0xff]   ;;  %v783_v39 = vld [vmem:[#allocation9 + $0x20] sm:$0xff]  }
  0x57   :  { %v784_v40 = vld [vmem:[#allocation9 + $0x28] sm:$0xff]   ;;  %v110_v44 = vld [vmem:[%s1106_s2] sm:$0x3] }
  0x58   :  { %215 = vmatpush1.bf16.msra.mxu0 %v749_v8  ;;  %680 = vmatpush3.bf16.msra.mxu1 %v768_v23  ;;  %v115_v46 = vrot.slane %v110_v44, %v114_v43  ;;  %v119_v47 = vrot.slane %v110_v44, %v118_v45  ;;  %v786_v15 = vld [vmem:[#allocation9 + $0x38] sm:$0xff]  }
  0x59   :  { %216 = vmatprep.subr.bf16.mxu0 %v750_v9  ;;  %681 = vmatprep.subr.bf16.mxu1 %v769_v24 }
  0x5c   :  { %217 = vmatpush1.bf16.msra.mxu0 %v752_v11  ;;  %682 = vmatpush3.bf16.msra.mxu1 %v770_v25 }
  0x5d   :  { %218 = vmatprep.subr.bf16.mxu0 %v753_v14  ;;  %683 = vmatprep.subr.bf16.mxu1 %v771_v26  ;;  %v785_v14 = vld [vmem:[#allocation9 + $0x30] sm:$0xff]   ;;  %v663_v26 = vld [vmem:[%s1110_s6] ss:$0 sm:$0xff]  ;;  %s936_s6 = smov [#allocation11]  }
  0x5e   :  { %s611_s11 = sshll.u32 %s936_s6, 4  ;;  %s612_s11 = int_to_ptr.vmem [resolvable:$true] %s611_s11 }
  0x5f   :  { %s895_s12 = scalar_lea.vmem %s612_s11, 256  ;;  %p900_p5 = scmp.lt.s32.totalorder %s612_s11, %s612_s11 }
  0x60   :  { %219 = vmatpush1.bf16.msra.mxu0 %v755_v16  ;;  %684 = vmatpush3.bf16.msra.mxu1 %v772_v27  ;;  %p896_p4 = scmp.ne.s32.totalorder %s612_s11, %s895_s12  ;;  %p901_p6 = scmp.lt.s32.totalorder %s895_s12, %s895_s12 }
  0x61   :  { %220 = vmatprep.subr.bf16.mxu0 %v756_v17  ;;  %685 = vmatprep.subr.bf16.mxu1 %v773_v28  ;;  %v646_v17 = vld [vmem:[%s1108_s4] ss:$0 sm:$0xff] }
  0x62   :  { %p902_p7 = por %p901_p6, %p900_p5 }
  0x64   :  { %221 = vmatpush1.bf16.msra.mxu0 %v758_v18  ;;  %686 = vmatpush3.bf16.msra.mxu1 %v774_v29  ;;  %p903_p8 = pnand %p902_p7, %p896_p4 }
  0x65   :  { %222 = vmatprep.subr.bf16.mxu0 %v759_v19  ;;  %687 = vmatprep.subr.bf16.mxu1 %v775_v30 }
  0x68   :  { %223 = vmatpush1.bf16.msra.mxu0 %v761_v20  ;;  %688 = vmatpush3.bf16.msra.mxu1 %v776_v31 }
  0x69   :  { %689 = vmatprep.subr.bf16.mxu1 %v777_v32  ;;  %706 = vmatprep.subr.bf16.mxu0 %v934_v35 }
  0x6b   :  { %241 = vmatmul.mubr.bf16.vlgmr.msra.gmra.mrb[0].mxu0 %v762_v21 }
  0x6c   :  { %690 = vmatpush3.bf16.msra.mxu1 %v778_v33  ;;  %707 = vmatpush3.bf16.msra.mxu0 %v779_v34 }
  0x6d   :  { %708 = vmatprep.subr.bf16.mxu0 %v934_v35  ;;  %722 = vmatprep.mubr.msk.bf16.mxu0 %vm935_vm0, %v934_v35 }
  0x70   :  { %709 = vmatpush3.bf16.msra.mxu0 %v780_v36 }
  0x71   :  { %710 = vmatprep.subr.bf16.mxu0 %v934_v35 }
  0x74   :  { %711 = vmatpush3.bf16.msra.mxu0 %v781_v37 }
  0x75   :  { %712 = vmatprep.subr.bf16.mxu0 %v934_v35 }
  0x78   :  { %713 = vmatpush3.bf16.msra.mxu0 %v782_v38 }
  0x79   :  { %714 = vmatprep.subr.bf16.mxu0 %v934_v35 }
  0x7c   :  { %715 = vmatpush3.bf16.msra.mxu0 %v783_v39  ;;  %v672_v39 = vld [vmem:[%s1111_s7] ss:$0 sm:$0xff] }
  0x7d   :  { %716 = vmatprep.subr.bf16.mxu0 %v934_v35 }
  0x80   :  { %717 = vmatpush3.bf16.msra.mxu0 %v784_v40 }
  0x81   :  { %718 = vmatprep.subr.bf16.mxu0 %v934_v35 }
  0x84   :  { %719 = vmatpush3.bf16.msra.mxu0 %v785_v14 }
  0x85   :  { %720 = vmatprep.subr.bf16.mxu0 %v934_v35 }
  0x88   :  { %721 = vmatpush3.bf16.msra.mxu0 %v786_v15 }
 0x13e   :  { %v242_v48 = vpop.f32.mrb[0].mxu0 }
 0x13f   :  { %v243_v49 = vadd.f32 %v242_v48, %v115_v46  ;;  %v244_v50 = vpop.f32.mrb[1].mxu0 }
 0x140   :  { %v245_v51 = vadd.f32 %v244_v50, %v119_v47  ;;  %v246_v52 = vpop.f32.mrb[2].mxu0 }
 0x141   :  { %v255_v53 = vmul.f32 0.70710677, %v243_v49  ;;  %v247_v54 = vadd.f32 %v246_v52, %v115_v46  ;;  %v248_v55 = vpop.f32.mrb[3].mxu0  ;;  %v251_v2 = vmul.f32 0.5, %v243_v49 }
 0x142   :  { %v256_v56 = vmul.f32 0.70710677, %v245_v51  ;;  %v249_v57 = vadd.f32 %v248_v55, %v119_v47  ;;  %v252_v5 = vmul.f32 0.5, %v245_v51 }
 0x143   :  { %787 = verf.f32 %v255_v53  ;;  %v257_v58 = vmul.f32 0.70710677, %v247_v54  ;;  %v253_v3 = vmul.f32 0.5, %v247_v54 }
 0x144   :  { %789 = verf.f32 %v256_v56  ;;  %v258_v59 = vmul.f32 0.70710677, %v249_v57  ;;  %v254_v6 = vmul.f32 0.5, %v249_v57 }
 0x145   :  { %791 = verf.f32 %v257_v58 }
 0x146   :  { %793 = verf.f32 %v258_v59 }
 0x14d   :  { %v788_v60 = vpop.eup %787 }
 0x14e   :  { %v790_v61 = vpop.eup %789  ;;  %v263_v62 = vadd.f32 1.0, %v788_v60 }
 0x14f   :  { %v792_v63 = vpop.eup %791  ;;  %v264_v0 = vadd.f32 1.0, %v790_v61 }
 0x150   :  { %v794_v1 = vpop.eup %793  ;;  %v265_v4 = vadd.f32 1.0, %v792_v63  ;;  %v267_v8 = vmul.f32 %v263_v62, %v251_v2 }
 0x151   :  { %v266_v7 = vadd.f32 1.0, %v794_v1  ;;  %v268_v10 = vmul.f32 %v264_v0, %v252_v5 }
 0x152   :  { %v269_v9 = vmul.f32 %v265_v4, %v253_v3 }
 0x153   :  { %v270_v11 = vmul.f32 %v266_v7, %v254_v6 }
 0x154   :  { %v271_v12 = vpack.c.bf16 %v269_v9, %v267_v8 }
 0x155   :  { %v272_v13 = vpack.c.bf16 %v270_v11, %v268_v10 }
 0x157   :  { %440 = vmatprep.mubr.bf16.mxu1 %v272_v13 }
 0x158   :  { %441 = vmatmul.mubr.bf16.vlgmr.msra.gmra.mrb[0].mxu1 %v271_v12 }
 0x22b   :  { %v691_v16 = vpop.f32.mrb[0].mxu1 }
 0x22c   :  { %v692_v18 = vpop.f32.mrb[1].mxu1 }
 0x22d   :  { %v693_v19 = vadd.f32 %v692_v18, %v691_v16  ;;  %v694_v20 = vpop.f32.mrb[2].mxu1 }
 0x22e   :  { %v695_v21 = vpop.f32.mrb[3].mxu1 }
 0x22f   :  { %v443_v22 = vadd.f32 %v693_v19, %v646_v17  ;;  %v696_v23 = vadd.f32 %v695_v21, %v694_v20 }
 0x231   :  { %449 = vst [vmem:[#allocation11] sm:$0xff] %v443_v22  ;;  %v446_v24 = vadd.f32 %v696_v23, %v646_v17 }
 0x233   :  { %v451_v25 = vpack.c.bf16 %v446_v24, %v443_v22  ;;  %450 = vst [vmem:[#allocation11 + $0x8] sm:$0xff] %v446_v24 }
 0x235   :  { %723 = vmatmul.mubr.bf16.vlgmr.msra.gmra.mrb[4].mxu0 %v451_v25 }
 0x308   :  { %v557_v27 = vpop.f32.mrb[4].mxu0 }
 0x309   :  { %v558_v28 = vadd.f32 %v663_v26, %v557_v27  ;;  %v724_v29 = vpop.f32.mrb[5].mxu0 }
 0x30a   :  { %v560_v30 = vpop.f32.mrb[6].mxu0 }
 0x30b   :  { %v566_v31 = vmul.f32 0.70710677, %v558_v28  ;;  %v561_v32 = vadd.f32 %v663_v26, %v560_v30  ;;  %v725_v33 = vpop.f32.mrb[7].mxu0  ;;  %v564_v36 = vmul.f32 0.5, %v558_v28 }
 0x30d   :  { %795 = verf.f32 %v566_v31  ;;  %v567_v34 = vmul.f32 0.70710677, %v561_v32  ;;  %v565_v40 = vmul.f32 0.5, %v561_v32 }
 0x30f   :  { %797 = verf.f32 %v567_v34 }
 0x317   :  { %v796_v35 = vpop.eup %795 }
 0x318   :  { %v570_v37 = vadd.f32 1.0, %v796_v35 }
 0x319   :  { %v798_v38 = vpop.eup %797 }
 0x31a   :  { %v572_v41 = vmul.f32 %v570_v37, %v564_v36  ;;  %v571_v42 = vadd.f32 1.0, %v798_v38 }
 0x31c   :  { %v581_v43 = vmul.f32 %v672_v39, %v572_v41  ;;  %v573_v44 = vmul.f32 %v571_v42, %v565_v40 }
 0x31e   :  { %583 = vadd.xlane.f32.xlu0 %v581_v43  ;;  %v582_v45 = vmul.f32 %v672_v39, %v573_v44 }
 0x322   :  { %585 = vadd.xlane.f32.xlu0 %v582_v45 }
 0x323   :  { %906 = shalt.err (!%p903_p8)
}
 0x324   :  { %s907_s0 = scalar_lea.hbm %s1113_s9, 256 }
 0x325   :  { %p908_p9 = scmp.ne.s32.totalorder %s1113_s9, %s907_s0  ;;  %p911_p10 = scmp.lt.u32.totalorder %s907_s0, %s1113_s9 }
 0x327   :  { %p913_p11 = pnand %p911_p10, %p908_p9 }
 0x329   :  { %916 = shalt.err (!%p913_p11)
}
 0x32a   :  { %617 = dma.vmem_to_hbm [thread:$0]  %s612_s11, 256, %s1113_s9, [#allocation5], %s926_s23, %s926_s23, %s927_s24   ;;  %vm603_vm1 = vcmask 7168  }
 0x32b   :  { %v588_v46 = vstv %s1112_s8 }
 0x3ab   :  { %v584_v47 = vpop.xlane.xlu0 %583 }
 0x3ac   :  { %v589_v48 = vadd.f32 %v588_v46, %v584_v47 }
 0x3ae   :  { %v673_v49 = vmul.f32 -1.442695, %v589_v48 }
 0x3af   :  { %v586_v50 = vpop.xlane.xlu0 %585 }
 0x3b0   :  { %799 = vpow2.f32 %v673_v49  ;;  %v590_v51 = vadd.f32 %v588_v46, %v586_v50 }
 0x3b2   :  { %v674_v52 = vmul.f32 -1.442695, %v590_v51 }
 0x3b4   :  { %801 = vpow2.f32 %v674_v52 }
 0x3ba   :  { %v800_v53 = vpop.eup %799 }
 0x3bb   :  { %v597_v54 = vadd.f32 1.0, %v800_v53 }
 0x3bd   :  { %803 = vrcp.f32 %v597_v54 }
 0x3be   :  { %v802_v55 = vpop.eup %801 }
 0x3bf   :  { %v598_v56 = vadd.f32 1.0, %v802_v55 }
 0x3c1   :  { %805 = vrcp.f32 %v598_v56 }
 0x3c7   :  { %v804_v57 = vpop.eup %803 }
 0x3c8   :  { %604 = vst.msk [vmem:[%s1114_s10] sm:$0xff] %vm603_vm1, %v804_v57 }
 0x3cb   :  { %v806_v58 = vpop.eup %805 }
 0x3cc   :  { %605 = vst.msk [vmem:[%s1114_s10 + $0x8] sm:$0xff] %vm603_vm1, %v806_v58 }
 0x3cd   :  { %923 = dma.done.wait [#allocation5], 256  }
 0x3ce   :  { %924 = vsyncadd [#allocation5], 4294967040 }
 0x3cf   :  { %625 = vsyncpa [#allocation4], 1 }
 0x3d0   :  { %626 = vsyncpa [#allocation7], 1 }
 0x3d1   :  { %627 = vsyncpa [#allocation10], 1 }
 0x3d2   :  { %628 = vsyncpa [#allocation5], 1 }

</bundles_post_ra>
